<compile_context>
chip_gen: v6e
topology: v6e:2x2x1
jax: 0.10.0
libtpu: 0.0.40
codegen_flags: <defaults>
</compile_context>

<pallas_src>
import functools

import jax
import jax.numpy as jnp
from jax import lax
from jax.experimental import pallas as pl
from jax.experimental.pallas import tpu as pltpu

_LN_EPS = 1e-5


# ----------------------------------------------------------------------------
# helpers
# ----------------------------------------------------------------------------
def _round_up(x, m):
    return ((x + m - 1) // m) * m


def _choose_row_tile(rows, max_tile=512):
    """Row tile: multiple of 8 sublanes, capped at max_tile (perf review: 512)."""
    if rows <= max_tile:
        return _round_up(rows, 8)
    return max_tile


def _choose_p_tile(P, max_tile=1024):
    """Patch tile for the kv kernel: full P when small, else a 128-multiple."""
    if P <= max_tile:
        return P
    for t in (1024, 512, 256, 128):
        if P % t == 0:
            return t
    return P


def harmonic_embedding(x, n_harmonic_functions, omega0=1.0):
    """Matches HarmonicEmbedding.forward (sin/cos of x * 2**k frequencies)."""
    freqs = omega0 * (2.0 ** jnp.arange(n_harmonic_functions, dtype=x.dtype))
    embed = (x[..., None] * freqs).reshape(*x.shape[:-1], -1)
    return jnp.concatenate([jnp.sin(embed), jnp.cos(embed)], axis=-1)


def _apply_act(y, act, lrelu_param):
    if act is None:
        return y
    if act == "relu":
        return jnp.maximum(y, 0.0)
    if act == "lrelu":
        return jnp.where(y >= 0.0, y, lrelu_param * y)
    if act == "tanh":
        return jnp.tanh(y)
    if act == "sigmoid":
        return jax.nn.sigmoid(y)
    raise NotImplementedError(act)


def _layernorm(h, g, beta, eps):
    # Independent cross-lane reductions (E[h^2] and mu don't depend on each
    # other) so they can overlap on the 2 XLUs of v6e/v7x.
    mu = jnp.mean(h, axis=-1, keepdims=True)
    ms = jnp.mean(h * h, axis=-1, keepdims=True)
    var = ms - mu * mu
    return (h - mu) * lax.rsqrt(var + eps) * g + beta


def _use_bf16_exp():
    # bf16 EUP exp is a win on v6e/v7x; keep f32 exp on older gens (no bf16 EUP).
    try:
        kind = jax.devices()[0].device_kind.lower()
        return not any(t in kind for t in ("v2", "v3", "v4", "v5"))
    except Exception:
        return False


# ----------------------------------------------------------------------------
# Fused row-MLP kernel: Linear+bias -> ReLU -> LayerNorm -> Linear+bias [-> act]
# (used for the q path; activations bf16, f32 MXU accumulation)
# ----------------------------------------------------------------------------
def _mlp_rows_kernel(x_ref, w1_ref, b1_ref, g_ref, beta_ref, w2_ref, b2_ref,
                     o_ref, *, act, lrelu_param, eps):
    x = x_ref[...].astype(jnp.bfloat16)                              # (TR, Cin)
    h = jnp.dot(x, w1_ref[...], preferred_element_type=jnp.float32) + b1_ref[...]
    h = jnp.maximum(h, 0.0)
    h = _layernorm(h, g_ref[...], beta_ref[...], eps)
    y = jnp.dot(h.astype(jnp.bfloat16), w2_ref[...],
                preferred_element_type=jnp.float32) + b2_ref[...]
    y = _apply_act(y, act, lrelu_param)
    o_ref[...] = y.astype(o_ref.dtype)


def mlp_block(x, p, act=None, lrelu_param=0.2, out_dtype=jnp.bfloat16,
              max_row_tile=512, vmem_limit=32 * 1024 * 1024):
    """Fused Linear->ReLU->LayerNorm->Linear(+act). x: (R, Cin) -> (R, Cout)."""
    R, Cin = x.shape
    Cmid = p["w1"].shape[1]
    Cout = p["w2"].shape[1]

    tile = _choose_row_tile(R, max_row_tile)
    Rp = _round_up(R, tile)
    if Rp != R:
        x = jnp.pad(x, ((0, Rp - R), (0, 0)))

    kernel = functools.partial(_mlp_rows_kernel, act=act,
                               lrelu_param=lrelu_param, eps=_LN_EPS)

    out = pl.pallas_call(
        kernel,
        out_shape=jax.ShapeDtypeStruct((Rp, Cout), out_dtype),
        grid=(Rp // tile,),
        in_specs=[
            pl.BlockSpec((tile, Cin), lambda i: (i, 0)),   # activations: row tiles
            pl.BlockSpec((Cin, Cmid), lambda i: (0, 0)),   # weights resident
            pl.BlockSpec((1, Cmid), lambda i: (0, 0)),
            pl.BlockSpec((1, Cmid), lambda i: (0, 0)),
            pl.BlockSpec((1, Cmid), lambda i: (0, 0)),
            pl.BlockSpec((Cmid, Cout), lambda i: (0, 0)),
            pl.BlockSpec((1, Cout), lambda i: (0, 0)),
        ],
        out_specs=pl.BlockSpec((tile, Cout), lambda i: (i, 0)),
        compiler_params=pltpu.CompilerParams(
            dimension_semantics=("parallel",),
            vmem_limit_bytes=vmem_limit),
    )(x, p["w1"], p["b1"], p["g"], p["beta"], p["w2"], p["b2"])

    return out[:R]


# ----------------------------------------------------------------------------
# Fused kv kernel, reading the raw (B, C, P) feature map — no HBM transpose.
# First matmul contracts dim 0 of the (C, TP) feat block with dim 0 of w1
# (transposed-LHS on the MXU), producing a (TP, Cmid) tile directly.
# ----------------------------------------------------------------------------
def _kv_from_feat_kernel(f_ref, w1_ref, b1_ref, g_ref, beta_ref, w2_ref,
                         b2_ref, o_ref, *, eps):
    f = f_ref[...].astype(jnp.bfloat16)                              # (C, TP)
    h = lax.dot_general(f, w1_ref[...], (((0,), (0,)), ((), ())),
                        preferred_element_type=jnp.float32)          # (TP, Cmid)
    h = h + b1_ref[...]
    h = jnp.maximum(h, 0.0)
    h = _layernorm(h, g_ref[...], beta_ref[...], eps)
    # Keep the fused 128->256 projection (full MXU column utilization).
    y = jnp.dot(h.astype(jnp.bfloat16), w2_ref[...],
                preferred_element_type=jnp.float32) + b2_ref[...]
    o_ref[...] = y.astype(o_ref.dtype)                               # (TP, 256)


def kv_projection(feat_cp, p, vmem_limit=32 * 1024 * 1024):
    """feat_cp: (B, C, P) -> fused kv tensor (B, P, 2*zdim) in bf16."""
    B, C, P = feat_cp.shape
    Cmid = p["w1"].shape[1]
    Cout = p["w2"].shape[1]
    tp = _choose_p_tile(P)
    assert P % tp == 0

    kernel = functools.partial(_kv_from_feat_kernel, eps=_LN_EPS)

    return pl.pallas_call(
        kernel,
        out_shape=jax.ShapeDtypeStruct((B, P, Cout), jnp.bfloat16),
        grid=(B, P // tp),
        in_specs=[
            pl.BlockSpec((None, C, tp), lambda b, j: (b, 0, j)),  # raw feat tiles
            pl.BlockSpec((C, Cmid), lambda b, j: (0, 0)),
            pl.BlockSpec((1, Cmid), lambda b, j: (0, 0)),
            pl.BlockSpec((1, Cmid), lambda b, j: (0, 0)),
            pl.BlockSpec((1, Cmid), lambda b, j: (0, 0)),
            pl.BlockSpec((Cmid, Cout), lambda b, j: (0, 0)),
            pl.BlockSpec((1, Cout), lambda b, j: (0, 0)),
        ],
        out_specs=pl.BlockSpec((None, tp, Cout), lambda b, j: (b, j, 0)),
        compiler_params=pltpu.CompilerParams(
            dimension_semantics=("parallel", "parallel"),
            vmem_limit_bytes=vmem_limit),
    )(feat_cp, p["w1"], p["b1"], p["g"], p["beta"], p["w2"], p["b2"])


# ----------------------------------------------------------------------------
# Fused attention + final-MLP kernel:
#   softmax(q @ k^T) @ v  ->  Linear -> ReLU -> LayerNorm -> Linear [-> act]
# k/v come from the same (B, P, 2*zdim) kv tensor via column-offset BlockSpecs
# (zero-copy split). Softmax normalization is deferred to a (TQ, d) multiply.
# ----------------------------------------------------------------------------
def _attn_final_kernel(q_ref, k_ref, v_ref, w1_ref, b1_ref, g_ref, beta_ref,
                       w2_ref, b2_ref, o_ref, *, act, lrelu_param, eps,
                       bf16_exp):
    q = q_ref[...]                                                   # (TQ, d) bf16
    k = k_ref[...]                                                   # (P, d)  bf16
    v = v_ref[...]                                                   # (P, d)  bf16
    # scores = q @ k^T (no 1/sqrt(d) scale, matching the PyTorch einsum).
    # TODO(synk): if the Mosaic dump shows a per-q-tile vxpose of k, feed k
    # pre-transposed as (B, d, P) instead.
    s = lax.dot_general(q, k, (((1,), (1,)), ((), ())),
                        preferred_element_type=jnp.float32)          # (TQ, P)
    m = jnp.max(s, axis=-1, keepdims=True)
    z = s - m
    if bf16_exp:
        p = jnp.exp(z.astype(jnp.bfloat16))          # bf16 EUP (v6e/v7x)
    else:
        p = jnp.exp(z).astype(jnp.bfloat16)          # f32 EUP (v5e and older)
    denom = jnp.sum(p.astype(jnp.float32), axis=-1, keepdims=True)
    o = jnp.dot(p, v, preferred_element_type=jnp.float32)            # (TQ, d)
    # Deferred normalization: (TQ, d) multiply instead of a (TQ, P) divide.
    o = o * pl.reciprocal(denom, approx=True)

    # Fused final MLP epilogue (zdim -> zdim -> vit_feat_dim).
    h = jnp.dot(o.astype(jnp.bfloat16), w1_ref[...],
                preferred_element_type=jnp.float32) + b1_ref[...]
    h = jnp.maximum(h, 0.0)
    h = _layernorm(h, g_ref[...], beta_ref[...], eps)
    y = jnp.dot(h.astype(jnp.bfloat16), w2_ref[...],
                preferred_element_type=jnp.float32) + b2_ref[...]
    y = _apply_act(y, act, lrelu_param)
    o_ref[...] = y.astype(o_ref.dtype)                               # (TQ, 384)


def attention_final(q, kv, p_final, *, zdim, act=None, lrelu_param=0.2,
                    bf16_exp=False, max_q_tile=512,
                    vmem_limit=48 * 1024 * 1024):
    """q: (B, n_p, zdim) bf16; kv: (B, P, 2*zdim) bf16 -> (B, n_p, 384) f32."""
    B, n_p, d = q.shape
    _, P, two_zdim = kv.shape
    assert d == zdim and two_zdim == 2 * zdim
    Cout = p_final["w2"].shape[1]

    tq = _choose_row_tile(n_p, max_q_tile)
    assert n_p % tq == 0

    kernel = functools.partial(_attn_final_kernel, act=act,
                               lrelu_param=lrelu_param, eps=_LN_EPS,
                               bf16_exp=bf16_exp)

    return pl.pallas_call(
        kernel,
        out_shape=jax.ShapeDtypeStruct((B, n_p, Cout), jnp.float32),
        grid=(B, n_p // tq),
        in_specs=[
            pl.BlockSpec((None, tq, zdim), lambda b, i: (b, i, 0)),   # q tiles
            # zero-copy k/v split of the fused kv tensor (column block 0 and 1):
            pl.BlockSpec((None, P, zdim), lambda b, i: (b, 0, 0)),    # k columns
            pl.BlockSpec((None, P, zdim), lambda b, i: (b, 0, 1)),    # v columns
            pl.BlockSpec((zdim, zdim), lambda b, i: (0, 0)),          # final MLP
            pl.BlockSpec((1, zdim), lambda b, i: (0, 0)),
            pl.BlockSpec((1, zdim), lambda b, i: (0, 0)),
            pl.BlockSpec((1, zdim), lambda b, i: (0, 0)),
            pl.BlockSpec((zdim, Cout), lambda b, i: (0, 0)),
            pl.BlockSpec((1, Cout), lambda b, i: (0, 0)),
        ],
        out_specs=pl.BlockSpec((None, tq, Cout), lambda b, i: (b, i, 0)),
        compiler_params=pltpu.CompilerParams(
            dimension_semantics=("parallel", "parallel"),
            vmem_limit_bytes=vmem_limit),
    )(q, kv, kv, p_final["w1"], p_final["b1"], p_final["g"], p_final["beta"],
      p_final["w2"], p_final["b2"])


# ----------------------------------------------------------------------------
# FeatureAttention forward
# ----------------------------------------------------------------------------
def feature_attention_forward(x, feat, params, *, zdim, embedder_freq=0,
                              activation=None, lrelu_param=0.2):
    bxf, vit_feat_dim, ph, pw = feat.shape
    if embedder_freq > 0:
        # cheap elementwise preprocessing done in plain JAX
        x = jnp.concatenate([x, harmonic_embedding(x, embedder_freq)], axis=-1)
    _, n, pos_dim = x.shape
    P = ph * pw

    # Pad the query-point axis once (multiple of the attention q tile).
    tq = _choose_row_tile(n, 512)
    n_p = _round_up(n, tq)
    if n_p != n:
        x = jnp.pad(x, ((0, 0), (0, n_p - n), (0, 0)))

    # Query path: fused 4-op MLP, bf16 intermediate in HBM.
    q = mlp_block(x.reshape(bxf * n_p, pos_dim), params["q"])
    q = q.reshape(bxf, n_p, zdim)

    # Key/value path straight off the (B, C, P) feature map (no HBM transpose),
    # fused 384 -> 128 -> 256 projection, bf16 output.
    kv = kv_projection(feat.reshape(bxf, vit_feat_dim, P), params["kv"])

    # Cross-attention fused with the final MLP (+ optional activation).
    out = attention_final(q, kv, params["final"], zdim=zdim, act=activation,
                          lrelu_param=lrelu_param, bf16_exp=_use_bf16_exp())
    return out[:, :n]


# ----------------------------------------------------------------------------
# Parameters (deterministic, PyTorch-default-ish init). Weights stored
# pre-transposed as (in, out) in bf16; biases / LN params as (1, C) f32.
# ----------------------------------------------------------------------------
def _init_mlp_block_params(key, cin, cmid, cout):
    ks = jax.random.split(key, 6)
    s1 = 1.0 / (cin ** 0.5)
    s2 = 1.0 / (cmid ** 0.5)
    return dict(
        w1=jax.random.uniform(ks[0], (cin, cmid), jnp.float32, -s1, s1
                              ).astype(jnp.bfloat16),
        b1=jax.random.uniform(ks[1], (1, cmid), jnp.float32, -s1, s1),
        g=1.0 + 0.1 * jax.random.normal(ks[2], (1, cmid), jnp.float32),
        beta=0.1 * jax.random.normal(ks[3], (1, cmid), jnp.float32),
        w2=jax.random.uniform(ks[4], (cmid, cout), jnp.float32, -s2, s2
                              ).astype(jnp.bfloat16),
        b2=jax.random.uniform(ks[5], (1, cout), jnp.float32, -s2, s2),
    )


def init_feature_attention_params(key, pos_dim, vit_feat_dim, zdim):
    kq, kkv, kf = jax.random.split(key, 3)
    return dict(
        q=_init_mlp_block_params(kq, pos_dim, zdim, zdim),
        kv=_init_mlp_block_params(kkv, vit_feat_dim, zdim, 2 * zdim),
        final=_init_mlp_block_params(kf, zdim, zdim, vit_feat_dim),
    )


# ----------------------------------------------------------------------------
# Pure-JAX reference (HIGHEST-precision f32, same bf16-representable weights).
# ----------------------------------------------------------------------------
def _mlp_block_ref(x, p, act=None, lrelu_param=0.2):
    hp = lax.Precision.HIGHEST
    h = jnp.dot(x, p["w1"].astype(jnp.float32), precision=hp) + p["b1"]
    h = jnp.maximum(h, 0.0)
    mu = jnp.mean(h, axis=-1, keepdims=True)
    var = jnp.mean(jnp.square(h - mu), axis=-1, keepdims=True)
    h = (h - mu) * lax.rsqrt(var + _LN_EPS)
    h = h * p["g"] + p["beta"]
    y = jnp.dot(h, p["w2"].astype(jnp.float32), precision=hp) + p["b2"]
    return _apply_act(y, act, lrelu_param)


def feature_attention_reference(x, feat, params, *, zdim, embedder_freq=0,
                                activation=None, lrelu_param=0.2):
    hp = lax.Precision.HIGHEST
    bxf, vit_feat_dim, ph, pw = feat.shape
    if embedder_freq > 0:
        x = jnp.concatenate([x, harmonic_embedding(x, embedder_freq)], axis=-1)
    _, n, pos_dim = x.shape
    P = ph * pw

    q = _mlp_block_ref(x.reshape(bxf * n, pos_dim), params["q"]).reshape(bxf, n, zdim)
    feat_in = jnp.transpose(feat.reshape(bxf, vit_feat_dim, P), (0, 2, 1))
    kv = _mlp_block_ref(feat_in.reshape(bxf * P, vit_feat_dim), params["kv"])
    kv = kv.reshape(bxf, P, 2 * zdim)
    k, v = kv[..., :zdim], kv[..., zdim:]

    s = jnp.einsum("bnd,bpd->bnp", q, k, precision=hp)
    a = jax.nn.softmax(s, axis=-1)
    out = jnp.einsum("bnp,bpd->bnd", a, v, precision=hp)

    out = _mlp_block_ref(out.reshape(bxf * n, zdim), params["final"],
                         act=activation, lrelu_param=lrelu_param)
    return out.reshape(bxf, n, vit_feat_dim)


# ----------------------------------------------------------------------------
if __name__ == "__main__":
    # FeatureAttention('dino_vits8', pos_dim=3, embedder_freq=2, zdim=128,
    #                  img_size=64) at small test shapes.
    vit_feat_dim = 384
    patch_size = 8
    img_size = 64
    zdim = 128
    embedder_freq = 2
    base_pos_dim = 3
    pos_dim = base_pos_dim * (2 * embedder_freq + 1)   # 15
    bxf, n_pts = 2, 16
    ph = pw = img_size // patch_size                   # 8 -> P = 64

    key = jax.random.PRNGKey(0)
    kx, kf, kp = jax.random.split(key, 3)
    x = jax.random.normal(kx, (bxf, n_pts, base_pos_dim), jnp.float32)
    feat = jax.random.normal(kf, (bxf, vit_feat_dim, ph, pw), jnp.float32)
    params = init_feature_attention_params(kp, pos_dim, vit_feat_dim, zdim)

    out = feature_attention_forward(x, feat, params, zdim=zdim,
                                    embedder_freq=embedder_freq, activation=None)
    out = jax.block_until_ready(out)

    ref = feature_attention_reference(x, feat, params, zdim=zdim,
                                      embedder_freq=embedder_freq, activation=None)
    assert out.shape == (bxf, n_pts, vit_feat_dim), out.shape
    assert bool(jnp.isfinite(out).all()), "non-finite output"
    # bf16 intermediates / bf16 MXU inputs (per perf review) -> looser tolerance
    # vs. the HIGHEST-precision f32 reference.
    assert jnp.allclose(out, ref, atol=5e-2, rtol=5e-2), "mismatch vs reference"

    print("KERNEL_OK")
</pallas_src>

<mosaic_0001>
module attributes {stable_mosaic.version = 11 : i64} {
  func.func @_mlp_rows_kernel(%arg0: i32, %arg1: memref<32x15xf32, #tpu.memory_space<vmem>>, %arg2: memref<15x128xbf16, #tpu.memory_space<vmem>>, %arg3: memref<1x128xf32, #tpu.memory_space<vmem>>, %arg4: memref<1x128xf32, #tpu.memory_space<vmem>>, %arg5: memref<1x128xf32, #tpu.memory_space<vmem>>, %arg6: memref<128x128xbf16, #tpu.memory_space<vmem>>, %arg7: memref<1x128xf32, #tpu.memory_space<vmem>>, %arg8: memref<32x128xbf16, #tpu.memory_space<vmem>>) attributes {dimension_semantics = [#tpu.dimension_semantics<parallel>], iteration_bounds = array<i64: 1>, scalar_prefetch = 0 : i64, scratch_operands = 0 : i64, tpu.core_type = #tpu.core_type<tc>, window_params = [{transform_indices = @transform_0, window_bounds = array<i64: 32, 15>}, {pipeline_mode = #tpu.pipeline_mode<synchronous>, transform_indices = @transform_1, window_bounds = array<i64: 15, 128>}, {pipeline_mode = #tpu.pipeline_mode<synchronous>, transform_indices = @transform_2, window_bounds = array<i64: 1, 128>}, {pipeline_mode = #tpu.pipeline_mode<synchronous>, transform_indices = @transform_3, window_bounds = array<i64: 1, 128>}, {pipeline_mode = #tpu.pipeline_mode<synchronous>, transform_indices = @transform_4, window_bounds = array<i64: 1, 128>}, {pipeline_mode = #tpu.pipeline_mode<synchronous>, transform_indices = @transform_5, window_bounds = array<i64: 128, 128>}, {pipeline_mode = #tpu.pipeline_mode<synchronous>, transform_indices = @transform_6, window_bounds = array<i64: 1, 128>}, {transform_indices = @transform_7, window_bounds = array<i64: 32, 128>}]} {
    %c0 = arith.constant 0 : index
    %c0_0 = arith.constant 0 : index
    %0 = vector.load %arg1[%c0, %c0_0] : memref<32x15xf32, #tpu.memory_space<vmem>>, vector<32x15xf32>
    %1 = arith.truncf %0 : vector<32x15xf32> to vector<32x15xbf16>
    %c0_1 = arith.constant 0 : index
    %c0_2 = arith.constant 0 : index
    %2 = vector.load %arg2[%c0_1, %c0_2] : memref<15x128xbf16, #tpu.memory_space<vmem>>, vector<15x128xbf16>
    %cst = arith.constant dense<0.000000e+00> : vector<32x128xf32>
    %3 = tpu.matmul %1, %2, %cst {dimension_numbers = #tpu.dot_dimension_numbers<[1], [0], [0], [1], [0, 0, 1, 1], [], []>} : vector<32x15xbf16>, vector<15x128xbf16>, vector<32x128xf32> -> vector<32x128xf32>
    %c0_3 = arith.constant 0 : index
    %c0_4 = arith.constant 0 : index
    %4 = vector.load %arg3[%c0_3, %c0_4] : memref<1x128xf32, #tpu.memory_space<vmem>>, vector<1x128xf32>
    %5 = vector.broadcast %4 : vector<1x128xf32> to vector<32x128xf32>
    %6 = arith.addf %3, %5 : vector<32x128xf32>
    %cst_5 = arith.constant 0.000000e+00 : f32
    %7 = vector.broadcast %cst_5 : f32 to vector<32x128xf32>
    %8 = arith.maximumf %6, %7 : vector<32x128xf32>
    %c0_6 = arith.constant 0 : index
    %c0_7 = arith.constant 0 : index
    %9 = vector.load %arg4[%c0_6, %c0_7] : memref<1x128xf32, #tpu.memory_space<vmem>>, vector<1x128xf32>
    %c0_8 = arith.constant 0 : index
    %c0_9 = arith.constant 0 : index
    %10 = vector.load %arg5[%c0_8, %c0_9] : memref<1x128xf32, #tpu.memory_space<vmem>>, vector<1x128xf32>
    %cst_10 = arith.constant dense<0.000000e+00> : vector<32xf32>
    %11 = vector.multi_reduction <add>, %8, %cst_10 [1] : vector<32x128xf32> to vector<32xf32>
    %12 = vector.shape_cast %11 : vector<32xf32> to vector<32x1xf32>
    %cst_11 = arith.constant 1.280000e+02 : f32
    %13 = vector.broadcast %cst_11 : f32 to vector<32x1xf32>
    %14 = arith.divf %12, %13 : vector<32x1xf32>
    %15 = arith.mulf %8, %8 : vector<32x128xf32>
    %cst_12 = arith.constant dense<0.000000e+00> : vector<32xf32>
    %16 = vector.multi_reduction <add>, %15, %cst_12 [1] : vector<32x128xf32> to vector<32xf32>
    %17 = vector.shape_cast %16 : vector<32xf32> to vector<32x1xf32>
    %cst_13 = arith.constant 1.280000e+02 : f32
    %18 = vector.broadcast %cst_13 : f32 to vector<32x1xf32>
    %19 = arith.divf %17, %18 : vector<32x1xf32>
    %20 = arith.mulf %14, %14 : vector<32x1xf32>
    %21 = arith.subf %19, %20 : vector<32x1xf32>
    %22 = vector.broadcast %14 : vector<32x1xf32> to vector<32x128xf32>
    %23 = arith.subf %8, %22 : vector<32x128xf32>
    %cst_14 = arith.constant 9.99999974E-6 : f32
    %24 = vector.broadcast %cst_14 : f32 to vector<32x1xf32>
    %25 = arith.addf %21, %24 : vector<32x1xf32>
    %26 = math.rsqrt %25 : vector<32x1xf32>
    %27 = vector.broadcast %26 : vector<32x1xf32> to vector<32x128xf32>
    %28 = arith.mulf %23, %27 : vector<32x128xf32>
    %29 = vector.broadcast %9 : vector<1x128xf32> to vector<32x128xf32>
    %30 = arith.mulf %28, %29 : vector<32x128xf32>
    %31 = vector.broadcast %10 : vector<1x128xf32> to vector<32x128xf32>
    %32 = arith.addf %30, %31 : vector<32x128xf32>
    %33 = arith.truncf %32 : vector<32x128xf32> to vector<32x128xbf16>
    %c0_15 = arith.constant 0 : index
    %c0_16 = arith.constant 0 : index
    %34 = vector.load %arg6[%c0_15, %c0_16] : memref<128x128xbf16, #tpu.memory_space<vmem>>, vector<128x128xbf16>
    %cst_17 = arith.constant dense<0.000000e+00> : vector<32x128xf32>
    %35 = tpu.matmul %33, %34, %cst_17 {dimension_numbers = #tpu.dot_dimension_numbers<[1], [0], [0], [1], [0, 0, 1, 1], [], []>} : vector<32x128xbf16>, vector<128x128xbf16>, vector<32x128xf32> -> vector<32x128xf32>
    %c0_18 = arith.constant 0 : index
    %c0_19 = arith.constant 0 : index
    %36 = vector.load %arg7[%c0_18, %c0_19] : memref<1x128xf32, #tpu.memory_space<vmem>>, vector<1x128xf32>
    %37 = vector.broadcast %36 : vector<1x128xf32> to vector<32x128xf32>
    %38 = arith.addf %35, %37 : vector<32x128xf32>
    %39 = arith.truncf %38 : vector<32x128xf32> to vector<32x128xbf16>
    %c0_20 = arith.constant 0 : index
    %c0_21 = arith.constant 0 : index
    %40 = vector.load %arg8[%c0_20, %c0_21] : memref<32x128xbf16, #tpu.memory_space<vmem>>, vector<32x128xbf16>
    tpu.vector_store %arg8[%c0_20, %c0_21], %39 {strides = array<i32>} : memref<32x128xbf16, #tpu.memory_space<vmem>>, vector<32x128xbf16>,
    return
  }
  func.func @transform_0(%arg0: i32) -> (i32, i32) {
    %c0_i32 = arith.constant 0 : i32
    %c0_i32_0 = arith.constant 0 : i32
    return %arg0, %c0_i32 : i32, i32
  }
  func.func @transform_1(%arg0: i32) -> (i32, i32) {
    %c0_i32 = arith.constant 0 : i32
    %c0_i32_0 = arith.constant 0 : i32
    %c0_i32_1 = arith.constant 0 : i32
    return %c0_i32, %c0_i32_0 : i32, i32
  }
  func.func @transform_2(%arg0: i32) -> (i32, i32) {
    %c0_i32 = arith.constant 0 : i32
    %c0_i32_0 = arith.constant 0 : i32
    %c0_i32_1 = arith.constant 0 : i32
    return %c0_i32, %c0_i32_0 : i32, i32
  }
  func.func @transform_3(%arg0: i32) -> (i32, i32) {
    %c0_i32 = arith.constant 0 : i32
    %c0_i32_0 = arith.constant 0 : i32
    %c0_i32_1 = arith.constant 0 : i32
    return %c0_i32, %c0_i32_0 : i32, i32
  }
  func.func @transform_4(%arg0: i32) -> (i32, i32) {
    %c0_i32 = arith.constant 0 : i32
    %c0_i32_0 = arith.constant 0 : i32
    %c0_i32_1 = arith.constant 0 : i32
    return %c0_i32, %c0_i32_0 : i32, i32
  }
  func.func @transform_5(%arg0: i32) -> (i32, i32) {
    %c0_i32 = arith.constant 0 : i32
    %c0_i32_0 = arith.constant 0 : i32
    %c0_i32_1 = arith.constant 0 : i32
    return %c0_i32, %c0_i32_0 : i32, i32
  }
  func.func @transform_6(%arg0: i32) -> (i32, i32) {
    %c0_i32 = arith.constant 0 : i32
    %c0_i32_0 = arith.constant 0 : i32
    %c0_i32_1 = arith.constant 0 : i32
    return %c0_i32, %c0_i32_0 : i32, i32
  }
  func.func @transform_7(%arg0: i32) -> (i32, i32) {
    %c0_i32 = arith.constant 0 : i32
    %c0_i32_0 = arith.constant 0 : i32
    return %arg0, %c0_i32 : i32, i32
  }
}

</mosaic_0001>

<bundles_post_ra>
// kernel: tpu_custom_call.1
= control target key start
LH: loop header
LB: loop body
LE: loop exit
PB: predicated region body
PF: predicated region fallthrough
CT: control target
= control target key end

     0   :  { %12 = vsyncpa [#allocation3], 0  ;;  %s610_s0 = inlined_call_operand.vmem [shape: f32[32,15], index: 0, kind: input, shape index: {}]   ;;  %s611_s1 = inlined_call_operand.vmem [shape: bf16[15,128], index: 1, kind: input, shape index: {}]   ;;  %s612_s2 = inlined_call_operand.vmem [shape: f32[1,128], index: 2, kind: input, shape index: {}]   ;;  %s613_s3 = inlined_call_operand.vmem [shape: f32[1,128], index: 3, kind: input, shape index: {}]   ;;  %s614_s4 = inlined_call_operand.vmem [shape: f32[1,128], index: 4, kind: input, shape index: {}]   ;;  %s615_s5 = inlined_call_operand.hbm [shape: bf16[128,128], index: 5, kind: input, shape index: {}]   ;;  %s616_s6 = inlined_call_operand.vmem [shape: f32[1,128], index: 6, kind: input, shape index: {}]   ;;  %s617_s7 = inlined_call_operand.hbm [shape: bf16[32,128], index: 7, kind: output, shape index: {}]  }
   0x1   :  { %13 = vsyncpa [#allocation4], 0  ;;  %s502_s24 = smov [#allocation2]  }
   0x2   :  { %s29_s25 = sshll.u32 %s502_s24, 4  ;;  %s30_s25 = int_to_ptr.vmem [resolvable:$true] %s29_s25 }
   0x3   :  { %s466_s26 = scalar_lea.vmem %s30_s25, 1024  ;;  %p471_p1 = scmp.lt.s32.totalorder %s30_s25, %s30_s25 }
   0x4   :  { %p467_p0 = scmp.ne.s32.totalorder %s30_s25, %s466_s26  ;;  %p472_p2 = scmp.lt.s32.totalorder %s466_s26, %s466_s26 }
   0x6   :  { %p473_p3 = por %p472_p2, %p471_p1 }
   0x8   :  { %p474_p4 = pnand %p473_p3, %p467_p0 }
   0xa   :  { %477 = shalt.err (!%p474_p4)
}
   0xb   :  { %s503_s27 = smov 64   ;;  %s504_s28 = smov 4  }
   0xc   :  { %35 = dma.hbm_to_vmem [thread:$0]  %s615_s5, 1024, %s30_s25, [#allocation3], %s503_s27, %s503_s27, %s504_s28  }
   0xd   :  { %498 = dma.done.wait [#allocation3], 1024  }
   0xe   :  { %499 = vsyncadd [#allocation3], 4294966272  ;;  %vm69_vm0 = vcmask 1046528   ;;  %vm70_vm1 = vcmask 1047552   ;;  %v505_v0 = vmov 65535   ;;  %v441_v3 = vld [vmem:[%s611_s1] sm:$0xff]  }
   0xf   :  { %v71_v1 = vsel %vm69_vm0, 4294967295, %v505_v0  ;;  %v42_v4 = vld [vmem:[%s610_s0] sm:$0xff]  ;;  %v43_v5 = vld [vmem:[%s610_s0 + $0x8] sm:$0xff]  ;;  %vm62_vm2 = vcmask 121856   ;;  %v44_v6 = vld [vmem:[%s610_s0 + $0x10] sm:$0xff] }
  0x10   :  { %v72_v2 = vsel %vm70_vm1, %v71_v1, 0  ;;  %v46_v8 = vpack.c.bf16 %v43_v5, %v42_v4  ;;  %v45_v9 = vld [vmem:[%s610_s0 + $0x18] sm:$0xff]  ;;  %v363_v11 = vld [vmem:[%s612_s2] ss:$0 sm:$0xff]  ;;  %v443_v29 = vld [vmem:[#allocation2 + $0x30] sm:$0xff]  }
  0x11   :  { %v74_v7 = vand.u32 %v441_v3, %v72_v2  ;;  %v47_v10 = vpack.c.bf16 %v45_v9, %v44_v6  ;;  %v442_v28 = vld [vmem:[#allocation2 + $0x38] sm:$0xff]   ;;  %v444_v30 = vld [vmem:[#allocation2 + $0x28] sm:$0xff]   ;;  %v445_v31 = vld [vmem:[#allocation2 + $0x20] sm:$0xff]  }
  0x12   :  { %412 = vmatprep.mubr.msk.bf16.mxu0 %vm62_vm2, %v46_v8  ;;  %416 = vmatprep.subr.bf16.mxu1 %v442_v28  ;;  %v446_v32 = vld [vmem:[#allocation2 + $0x18] sm:$0xff]   ;;  %v447_v33 = vld [vmem:[#allocation2 + $0x10] sm:$0xff]   ;;  %v448_v34 = vld [vmem:[#allocation2 + $0x8] sm:$0xff]  }
  0x13   :  { %410 = vmatprep.subr.bf16.mxu0 %v74_v7  ;;  %417 = vmatpush3.bf16.msra.mxu1 %v442_v28  ;;  %v449_v35 = vld [vmem:[#allocation2] sm:$0xff]  }
  0x14   :  { %411 = vmatpush3.bf16.msra.mxu0 %v74_v7  ;;  %418 = vmatprep.subr.bf16.mxu1 %v443_v29  ;;  %v367_v3 = vld [vmem:[%s613_s3] ss:$0 sm:$0xff] }
  0x17   :  { %413 = vmatmul.mubr.msk.bf16.vlgmr.msra.gmra.mxu0 %vm62_vm2, %v47_v10  ;;  %419 = vmatpush3.bf16.msra.mxu1 %v443_v29 }
  0x18   :  { %420 = vmatprep.subr.bf16.mxu1 %v444_v30 }
  0x1b   :  { %421 = vmatpush3.bf16.msra.mxu1 %v444_v30 }
  0x1c   :  { %422 = vmatprep.subr.bf16.mxu1 %v445_v31 }
  0x1f   :  { %423 = vmatpush3.bf16.msra.mxu1 %v445_v31 }
  0x20   :  { %424 = vmatprep.subr.bf16.mxu1 %v446_v32 }
  0x23   :  { %425 = vmatpush3.bf16.msra.mxu1 %v446_v32 }
  0x24   :  { %426 = vmatprep.subr.bf16.mxu1 %v447_v33 }
  0x27   :  { %427 = vmatpush3.bf16.msra.mxu1 %v447_v33 }
  0x28   :  { %428 = vmatprep.subr.bf16.mxu1 %v448_v34 }
  0x2b   :  { %429 = vmatpush3.bf16.msra.mxu1 %v448_v34 }
  0x2c   :  { %430 = vmatprep.subr.bf16.mxu1 %v449_v35 }
  0x2f   :  { %431 = vmatpush3.bf16.msra.mxu1 %v449_v35 }
  0xd7   :  { %v414_v12 = vpop.f32.mrf.mxu0 }
  0xd8   :  { %v119_v13 = vadd.f32 %v414_v12, %v363_v11  ;;  %v368_v12 = vld [vmem:[%s614_s4] ss:$0 sm:$0xff]  ;;  %s506_s4 = smov [#allocation5]  }
  0xd9   :  { %v110_v14 = vpop.f32.mrf.mxu0  ;;  %s351_s21 = sshll.u32 %s506_s4, 4  ;;  %s352_s21 = int_to_ptr.vmem [resolvable:$true] %s351_s21 }
  0xda   :  { %v571_v15 = vmax.f32 %v119_v13, 0.0  ;;  %v111_v16 = vadd.f32 %v363_v11, %v110_v14  ;;  %s478_s22 = scalar_lea.vmem %s352_s21, 256  ;;  %p483_p6 = scmp.lt.s32.totalorder %s352_s21, %s352_s21 }
  0xdb   :  { %v415_v17 = vpop.f32.mrf.mxu0  ;;  %p479_p5 = scmp.ne.s32.totalorder %s352_s21, %s478_s22  ;;  %p484_p7 = scmp.lt.s32.totalorder %s478_s22, %s478_s22 }
  0xdc   :  { %v573_v18 = vmax.f32 %v111_v16, 0.0  ;;  %v122_v19 = vadd.f32 %v415_v17, %v363_v11  ;;  %135 = vadd.xlane.f32.xlu1 %v571_v15  ;;  %v146_v27 = vmul.f32 %v571_v15, %v571_v15 }
  0xdd   :  { %v113_v20 = vpop.f32.mrf.mxu0  ;;  %p485_p8 = por %p484_p7, %p483_p6 }
  0xde   :  { %v576_v21 = vmax.f32 %v122_v19, 0.0  ;;  %v114_v22 = vadd.f32 %v363_v11, %v113_v20  ;;  %131 = vadd.xlane.f32.xlu0 %v573_v18  ;;  %v144_v24 = vmul.f32 %v573_v18, %v573_v18 }
  0xdf   :  { %p486_p9 = pnand %p485_p8, %p479_p5 }
  0xe0   :  { %v579_v23 = vmax.f32 %v114_v22, 0.0  ;;  %137 = vadd.xlane.f32.xlu1 %v576_v21  ;;  %v147_v26 = vmul.f32 %v576_v21, %v576_v21 }
  0xe2   :  { %148 = vadd.xlane.f32.xlu0 %v144_v24  ;;  %v145_v25 = vmul.f32 %v579_v23, %v579_v23 }
  0xe4   :  { %150 = vadd.xlane.f32.xlu1 %v145_v25  ;;  %v369_v25 = vld [vmem:[%s616_s6] ss:$0 sm:$0xff] }
  0xe6   :  { %133 = vadd.xlane.f32.xlu0 %v579_v23 }
  0xe8   :  { %154 = vadd.xlane.f32.xlu1 %v147_v26 }
  0xea   :  { %152 = vadd.xlane.f32.xlu0 %v146_v27 }
 0x165   :  { %v136_v36 = vpop.xlane.xlu1 %135 }
 0x166   :  { %v142_v47 = vmul.f32 0.0078125, %v136_v36 }
 0x167   :  { %v132_v37 = vpop.xlane.xlu0 %131 }
 0x168   :  { %v140_v38 = vmul.f32 0.0078125, %v132_v37  ;;  %v162_v56 = vmul.f32 %v142_v47, %v142_v47  ;;  %v170_v8 = vsub.f32 %v571_v15, %v142_v47 }
 0x169   :  { %v138_v39 = vpop.xlane.xlu1 %137 }
 0x16a   :  { %v160_v41 = vmul.f32 %v140_v38, %v140_v38  ;;  %v143_v43 = vmul.f32 0.0078125, %v138_v39  ;;  %v168_v1 = vsub.f32 %v573_v18, %v140_v38 }
 0x16b   :  { %v149_v40 = vpop.xlane.xlu0 %148 }
 0x16c   :  { %v156_v42 = vmul.f32 0.0078125, %v149_v40  ;;  %v163_v50 = vmul.f32 %v143_v43, %v143_v43  ;;  %v171_v6 = vsub.f32 %v576_v21, %v143_v43 }
 0x16d   :  { %v151_v44 = vpop.xlane.xlu1 %150 }
 0x16e   :  { %v164_v45 = vsub.f32 %v156_v42, %v160_v41  ;;  %v157_v52 = vmul.f32 0.0078125, %v151_v44 }
 0x16f   :  { %v134_v46 = vpop.xlane.xlu0 %133 }
 0x170   :  { %v172_v48 = vadd.f32 1e-05, %v164_v45  ;;  %v141_v49 = vmul.f32 0.0078125, %v134_v46 }
 0x171   :  { %v155_v51 = vpop.xlane.xlu1 %154 }
 0x172   :  { %450 = vrsqrt.f32 %v172_v48  ;;  %v161_v53 = vmul.f32 %v141_v49, %v141_v49  ;;  %v159_v54 = vmul.f32 0.0078125, %v155_v51  ;;  %v169_v4 = vsub.f32 %v579_v23, %v141_v49 }
 0x173   :  { %v153_v55 = vpop.xlane.xlu0 %152 }
 0x174   :  { %v165_v57 = vsub.f32 %v157_v52, %v161_v53  ;;  %v167_v58 = vsub.f32 %v159_v54, %v163_v50  ;;  %v158_v59 = vmul.f32 0.0078125, %v153_v55 }
 0x176   :  { %v173_v60 = vadd.f32 1e-05, %v165_v57  ;;  %v175_v61 = vadd.f32 1e-05, %v167_v58  ;;  %v166_v62 = vsub.f32 %v158_v59, %v162_v56 }
 0x178   :  { %452 = vrsqrt.f32 %v173_v60  ;;  %v174_v63 = vadd.f32 1e-05, %v166_v62 }
 0x179   :  { %454 = vrsqrt.f32 %v175_v61 }
 0x17a   :  { %456 = vrsqrt.f32 %v174_v63 }
 0x17f   :  { %v451_v0 = vpop.eup %450 }
 0x180   :  { %v180_v2 = vmul.f32 %v451_v0, %v168_v1 }
 0x182   :  { %v190_v10 = vmul.f32 %v367_v3, %v180_v2 }
 0x184   :  { %v200_v18 = vadd.f32 %v368_v12, %v190_v10 }
 0x185   :  { %v453_v5 = vpop.eup %452 }
 0x186   :  { %v455_v7 = vpop.eup %454  ;;  %v181_v9 = vmul.f32 %v453_v5, %v169_v4 }
 0x187   :  { %v457_v11 = vpop.eup %456  ;;  %v183_v13 = vmul.f32 %v455_v7, %v171_v6 }
 0x188   :  { %v191_v14 = vmul.f32 %v367_v3, %v181_v9  ;;  %v182_v16 = vmul.f32 %v457_v11, %v170_v8 }
 0x189   :  { %v193_v17 = vmul.f32 %v367_v3, %v183_v13 }
 0x18a   :  { %v201_v19 = vadd.f32 %v368_v12, %v191_v14  ;;  %v192_v20 = vmul.f32 %v367_v3, %v182_v16 }
 0x18b   :  { %v203_v21 = vadd.f32 %v368_v12, %v193_v17 }
 0x18c   :  { %v204_v22 = vpack.c.bf16 %v201_v19, %v200_v18  ;;  %v202_v23 = vadd.f32 %v368_v12, %v192_v20 }
 0x18e   :  { %432 = vmatprep.mubr.bf16.mxu1 %v204_v22  ;;  %v205_v24 = vpack.c.bf16 %v203_v21, %v202_v23 }
 0x190   :  { %433 = vmatmul.mubr.bf16.vlgmr.msra.gmra.mxu1 %v205_v24 }
 0x250   :  { %v434_v15 = vpop.f32.mrf.mxu1 }
 0x251   :  { %v320_v28 = vadd.f32 %v434_v15, %v369_v25 }
 0x252   :  { %v311_v26 = vpop.f32.mrf.mxu1 }
 0x253   :  { %v312_v31 = vadd.f32 %v369_v25, %v311_v26 }
 0x254   :  { %v435_v27 = vpop.f32.mrf.mxu1 }
 0x255   :  { %v323_v29 = vadd.f32 %v435_v27, %v369_v25 }
 0x256   :  { %v314_v30 = vpop.f32.mrf.mxu1 }
 0x257   :  { %v394_v32 = vpack.c.bf16 %v323_v29, %v320_v28  ;;  %v315_v33 = vadd.f32 %v369_v25, %v314_v30 }
 0x259   :  { %396 = vst [vmem:[#allocation5 + $0x8] sm:$0xff] %v394_v32   ;;  %v389_v34 = vpack.c.bf16 %v315_v33, %v312_v31 }
 0x25b   :  { %390 = vst [vmem:[#allocation5] sm:$0xff] %v389_v34  }
 0x25c   :  { %489 = shalt.err (!%p486_p9)
}
 0x25d   :  { %357 = dma.vmem_to_hbm [thread:$0]  %s352_s21, 256, %s617_s7, [#allocation4], %s503_s27, %s503_s27, %s504_s28  }
 0x25e   :  { %500 = dma.done.wait [#allocation4], 256  }
 0x25f   :  { %501 = vsyncadd [#allocation4], 4294967040 }
 0x260   :  { %361 = vsyncpa [#allocation3], 1 }
 0x261   :  { %362 = vsyncpa [#allocation4], 1 }

</bundles_post_ra>
